<compile_context>
chip_gen: v7x
topology: tpu7x:2x2x1
jax: 0.10.0
libtpu: 0.0.40
codegen_flags: <defaults>
</compile_context>

<pallas_src>
import jax
import jax.numpy as jnp
from jax.experimental import pallas as pl
from jax.experimental.pallas import tpu as pltpu


# --------------------------------------------------------------------------------------
# Kernels
# --------------------------------------------------------------------------------------
def _affine_kernel(x_ref, w_ref, b_ref, o_ref):
    """o = x @ w - b.   x:(TB,K) f32, w:(K,N) bf16, b:(1,N) f32, o:(TB,N) bf16."""
    x = x_ref[...].astype(jnp.bfloat16)                                  # in-kernel cast (VPU)
    acc = jnp.dot(x, w_ref[...], preferred_element_type=jnp.float32)    # MXU, f32 accumulate
    o_ref[...] = (acc - b_ref[...]).astype(o_ref.dtype)


def _affine_both_kernel(x_ref, w_phi_ref, b_phi_ref, w_out_ref, b_out_ref,
                        phi_ref, out_ref):
    """Shapley values AND their feature-sum from one pass over the x tile."""
    x = x_ref[...].astype(jnp.bfloat16)
    phi = jnp.dot(x, w_phi_ref[...], preferred_element_type=jnp.float32) - b_phi_ref[...]
    phi_ref[...] = phi.astype(phi_ref.dtype)
    out = jnp.dot(x, w_out_ref[...], preferred_element_type=jnp.float32) - b_out_ref[...]
    out_ref[...] = out.astype(out_ref.dtype)


# --------------------------------------------------------------------------------------
# Planning helpers (tile sizing / VMEM budget)
# --------------------------------------------------------------------------------------
def _round_up(x, m):
    return ((x + m - 1) // m) * m


def _vmem_limit_bytes():
    """Generation-aware scoped-VMEM limit: ~3/4 of physical, capped so a config tuned on
    v5e/v6e (128 MiB) cannot blow past v7x's 64 MiB."""
    try:
        cap = int(pltpu.get_tpu_info().vmem_capacity_bytes)
    except Exception:                                  # query unavailable -> v7x-safe default
        cap = 64 * 1024 * 1024
    return int(min(cap * 3 // 4, 96 * 1024 * 1024))


def _pick_batch_tile(B, bytes_per_row, pipeline_budget):
    """Largest double-buffered (in+out) batch tile that fits the pipeline budget, multiple of
    16 rows (bf16 packs 2 rows/sublane), capped at ~B/8 so the grid keeps >= ~8 steps for v7x
    megacore sharding + pipelining."""
    tb = max(16, pipeline_budget // max(2 * bytes_per_row, 1))
    tb = min(tb, 2048)
    if B >= 8 * 16:
        tb = min(tb, B // 8)
    tb = max(16, (tb // 16) * 16)
    if tb >= B:
        tb = _round_up(B, 8)            # single (possibly ragged) block for tiny batches
    return int(tb)


def _plan(B, K, out_widths):
    vmem_limit = _vmem_limit_bytes()
    resident = 2 * sum(K * n * 2 + n * 4 for n in out_widths)   # dbl-buffered weights + biases
    bytes_per_row = K * 4 + sum(n * 2 for n in out_widths)      # f32 input row + bf16 out rows
    budget = max(vmem_limit // 2 - resident, 1 << 20)
    tb = _pick_batch_tile(B, bytes_per_row, budget)
    return tb, int(pl.cdiv(B, tb)), vmem_limit


# --------------------------------------------------------------------------------------
# Parameter preparation (one-time, analogue of the module's __init__ buffers)
# --------------------------------------------------------------------------------------
def prepare_shapley_params(weight, reference_values, in_channel):
    """weight: (F, C, O) per-feature linear Shapley map; reference_values: (F, C)."""
    F, C, O = weight.shape
    assert C == in_channel
    K = F * C
    n_phi = F * O
    n_phi_pad = _round_up(max(n_phi, 128), 128)      # lane-dense Shapley-value output width
    o_pad = _round_up(max(O, 128), 128)              # lane-dense reduced-output width

    w_bf = weight.astype(jnp.bfloat16)

    # Block-diagonal bf16 weight via scatter (no (F,C,F,O) f32 intermediate).
    f_idx = jnp.arange(F)
    w_bd = jnp.zeros((F, C, F, O), dtype=jnp.bfloat16)
    w_bd = w_bd.at[f_idx, :, f_idx, :].set(w_bf)
    w_phi = jnp.pad(w_bd.reshape(K, n_phi), ((0, 0), (0, n_phi_pad - n_phi)))

    # Flat weight for the unexplained path (== sum of the per-feature maps), zero-padded lanes.
    w_out = jnp.pad(w_bf.reshape(K, O), ((0, 0), (0, o_pad - O)))

    # Reference subtraction folded into exact f32 biases:  (x - r) @ W == x @ W - r @ W.
    ref32 = reference_values.astype(jnp.float32)
    bias_fo = jnp.einsum("fc,fco->fo", ref32, weight.astype(jnp.float32))     # (F, O)
    b_phi = jnp.pad(bias_fo.reshape(1, n_phi), ((0, 0), (0, n_phi_pad - n_phi)))
    b_out = jnp.pad(bias_fo.sum(0, keepdims=True), ((0, 0), (0, o_pad - O)))

    return {"w_phi": w_phi, "b_phi": b_phi, "w_out": w_out, "b_out": b_out,
            "F": F, "C": C, "O": O}


# --------------------------------------------------------------------------------------
# Forward wrappers (mirror ShapleyNetwork.forward semantics)
# --------------------------------------------------------------------------------------
def shapley_network_forward(x_flat, params, *, explain=False):
    """x_flat: (B, F*C) f32.  explain=True -> (B, F, O) Shapley values;
    explain=False -> (B, O) model output (local-accuracy sum over features)."""
    B, K = x_flat.shape
    F, O = params["F"], params["O"]
    w = params["w_phi"] if explain else params["w_out"]
    b = params["b_phi"] if explain else params["b_out"]
    N = w.shape[1]

    tb, grid, vmem_limit = _plan(B, K, (N,))
    out = pl.pallas_call(
        _affine_kernel,
        out_shape=jax.ShapeDtypeStruct((B, N), jnp.bfloat16),
        grid_spec=pltpu.PrefetchScalarGridSpec(
            num_scalar_prefetch=0,
            grid=(grid,),
            in_specs=[
                pl.BlockSpec((tb, K), lambda i: (i, 0)),   # batch tile of flat f32 inputs
                pl.BlockSpec((K, N), lambda i: (0, 0)),    # resident bf16 weight
                pl.BlockSpec((1, N), lambda i: (0, 0)),    # resident f32 bias (= ref @ W)
            ],
            out_specs=pl.BlockSpec((tb, N), lambda i: (i, 0)),
        ),
        compiler_params=pltpu.CompilerParams(
            dimension_semantics=("parallel",),             # batch axis: megacore-shardable
            vmem_limit_bytes=vmem_limit,
        ),
    )(x_flat, w, b)

    if explain:
        return out[:, : F * O].reshape(B, F, O)
    return out[:, :O]


def shapley_network_forward_both(x_flat, params):
    """Shapley values (B,F,O) AND reduced output (B,O) from one kernel / one pass over x."""
    B, K = x_flat.shape
    F, O = params["F"], params["O"]
    w_phi, b_phi = params["w_phi"], params["b_phi"]
    w_out, b_out = params["w_out"], params["b_out"]
    n_phi, n_out = w_phi.shape[1], w_out.shape[1]

    tb, grid, vmem_limit = _plan(B, K, (n_phi, n_out))
    phi, out = pl.pallas_call(
        _affine_both_kernel,
        out_shape=(jax.ShapeDtypeStruct((B, n_phi), jnp.bfloat16),
                   jax.ShapeDtypeStruct((B, n_out), jnp.bfloat16)),
        grid_spec=pltpu.PrefetchScalarGridSpec(
            num_scalar_prefetch=0,
            grid=(grid,),
            in_specs=[
                pl.BlockSpec((tb, K), lambda i: (i, 0)),
                pl.BlockSpec((K, n_phi), lambda i: (0, 0)),
                pl.BlockSpec((1, n_phi), lambda i: (0, 0)),
                pl.BlockSpec((K, n_out), lambda i: (0, 0)),
                pl.BlockSpec((1, n_out), lambda i: (0, 0)),
            ],
            out_specs=[
                pl.BlockSpec((tb, n_phi), lambda i: (i, 0)),
                pl.BlockSpec((tb, n_out), lambda i: (i, 0)),
            ],
        ),
        compiler_params=pltpu.CompilerParams(
            dimension_semantics=("parallel",),
            vmem_limit_bytes=vmem_limit,
        ),
    )(x_flat, w_phi, b_phi, w_out, b_out)

    return phi[:, : F * O].reshape(B, F, O), out[:, :O]


# --------------------------------------------------------------------------------------
if __name__ == "__main__":
    key = jax.random.PRNGKey(0)
    B, F, C, O = 8, 8, 4, 32  # batch, features, in_channel, out_channel

    k_x, k_w, k_r = jax.random.split(key, 3)
    x_flat = jax.random.normal(k_x, (B, F * C), dtype=jnp.float32)       # (batch, features*in_channel)
    weight = jax.random.normal(k_w, (F, C, O), dtype=jnp.float32) * 0.1  # per-feature linear map
    # Module default is torch.zeros(F, C); use nonzero values here to exercise the folded bias.
    reference_values = jax.random.normal(k_r, (F, C), dtype=jnp.float32) * 0.5

    params = prepare_shapley_params(weight, reference_values, in_channel=C)

    # Combined kernel (one pass over x) + the two single-output module-semantics paths.
    phi, out = shapley_network_forward_both(x_flat, params)
    phi_only = shapley_network_forward(x_flat, params, explain=True)
    out_only = shapley_network_forward(x_flat, params, explain=False)
    jax.block_until_ready((phi, out, phi_only, out_only))

    # Pure-JAX f32 reference for both branches + local-accuracy consistency.
    # Tolerances account for bf16 inputs/weights/outputs (f32 accumulation in-kernel).
    x3 = x_flat.reshape(B, F, C)
    phi_ref = jnp.einsum("bfc,fco->bfo", x3 - reference_values[None], weight)
    out_ref = phi_ref.sum(axis=1)
    assert phi.shape == (B, F, O) and out.shape == (B, O)
    assert phi_only.shape == (B, F, O) and out_only.shape == (B, O)
    for p in (phi, phi_only):
        assert jnp.allclose(p.astype(jnp.float32), phi_ref, atol=3e-2, rtol=3e-2)
    for o in (out, out_only):
        assert jnp.allclose(o.astype(jnp.float32), out_ref, atol=3e-2, rtol=3e-2)
    # Local accuracy property: sum of Shapley values == model output (bf16 outputs -> loose tol).
    assert jnp.allclose(phi.astype(jnp.float32).sum(axis=1),
                        out.astype(jnp.float32), atol=3e-2, rtol=3e-2)

    print("KERNEL_OK")
</pallas_src>

<mosaic_0001>
module attributes {stable_mosaic.version = 11 : i64} {
  func.func @_affine_both_kernel(%arg0: i32, %arg1: memref<8x32xf32, #tpu.memory_space<vmem>>, %arg2: memref<32x256xbf16, #tpu.memory_space<vmem>>, %arg3: memref<1x256xf32, #tpu.memory_space<vmem>>, %arg4: memref<32x128xbf16, #tpu.memory_space<vmem>>, %arg5: memref<1x128xf32, #tpu.memory_space<vmem>>, %arg6: memref<8x256xbf16, #tpu.memory_space<vmem>>, %arg7: memref<8x128xbf16, #tpu.memory_space<vmem>>) attributes {dimension_semantics = [#tpu.dimension_semantics<parallel>], iteration_bounds = array<i64: 1>, scalar_prefetch = 0 : i64, scratch_operands = 0 : i64, tpu.core_type = #tpu.core_type<tc>, window_params = [{transform_indices = @transform_0, window_bounds = array<i64: 8, 32>}, {pipeline_mode = #tpu.pipeline_mode<synchronous>, transform_indices = @transform_1, window_bounds = array<i64: 32, 256>}, {pipeline_mode = #tpu.pipeline_mode<synchronous>, transform_indices = @transform_2, window_bounds = array<i64: 1, 256>}, {pipeline_mode = #tpu.pipeline_mode<synchronous>, transform_indices = @transform_3, window_bounds = array<i64: 32, 128>}, {pipeline_mode = #tpu.pipeline_mode<synchronous>, transform_indices = @transform_4, window_bounds = array<i64: 1, 128>}, {transform_indices = @transform_5, window_bounds = array<i64: 8, 256>}, {transform_indices = @transform_6, window_bounds = array<i64: 8, 128>}]} {
    %c0 = arith.constant 0 : index
    %c0_0 = arith.constant 0 : index
    %0 = vector.load %arg1[%c0, %c0_0] : memref<8x32xf32, #tpu.memory_space<vmem>>, vector<8x32xf32>
    %1 = arith.truncf %0 : vector<8x32xf32> to vector<8x32xbf16>
    %c0_1 = arith.constant 0 : index
    %c0_2 = arith.constant 0 : index
    %2 = vector.load %arg2[%c0_1, %c0_2] : memref<32x256xbf16, #tpu.memory_space<vmem>>, vector<32x256xbf16>
    %cst = arith.constant dense<0.000000e+00> : vector<8x256xf32>
    %3 = tpu.matmul %1, %2, %cst {dimension_numbers = #tpu.dot_dimension_numbers<[1], [0], [0], [1], [0, 0, 1, 1], [], []>} : vector<8x32xbf16>, vector<32x256xbf16>, vector<8x256xf32> -> vector<8x256xf32>
    %c0_3 = arith.constant 0 : index
    %c0_4 = arith.constant 0 : index
    %4 = vector.load %arg3[%c0_3, %c0_4] : memref<1x256xf32, #tpu.memory_space<vmem>>, vector<1x256xf32>
    %5 = vector.broadcast %4 : vector<1x256xf32> to vector<8x256xf32>
    %6 = arith.subf %3, %5 : vector<8x256xf32>
    %7 = arith.truncf %6 : vector<8x256xf32> to vector<8x256xbf16>
    %c0_5 = arith.constant 0 : index
    %c0_6 = arith.constant 0 : index
    %8 = vector.load %arg6[%c0_5, %c0_6] : memref<8x256xbf16, #tpu.memory_space<vmem>>, vector<8x256xbf16>
    tpu.vector_store %arg6[%c0_5, %c0_6], %7 {strides = array<i32>} : memref<8x256xbf16, #tpu.memory_space<vmem>>, vector<8x256xbf16>,
    %c0_7 = arith.constant 0 : index
    %c0_8 = arith.constant 0 : index
    %9 = vector.load %arg4[%c0_7, %c0_8] : memref<32x128xbf16, #tpu.memory_space<vmem>>, vector<32x128xbf16>
    %cst_9 = arith.constant dense<0.000000e+00> : vector<8x128xf32>
    %10 = tpu.matmul %1, %9, %cst_9 {dimension_numbers = #tpu.dot_dimension_numbers<[1], [0], [0], [1], [0, 0, 1, 1], [], []>} : vector<8x32xbf16>, vector<32x128xbf16>, vector<8x128xf32> -> vector<8x128xf32>
    %c0_10 = arith.constant 0 : index
    %c0_11 = arith.constant 0 : index
    %11 = vector.load %arg5[%c0_10, %c0_11] : memref<1x128xf32, #tpu.memory_space<vmem>>, vector<1x128xf32>
    %12 = vector.broadcast %11 : vector<1x128xf32> to vector<8x128xf32>
    %13 = arith.subf %10, %12 : vector<8x128xf32>
    %14 = arith.truncf %13 : vector<8x128xf32> to vector<8x128xbf16>
    %c0_12 = arith.constant 0 : index
    %c0_13 = arith.constant 0 : index
    %15 = vector.load %arg7[%c0_12, %c0_13] : memref<8x128xbf16, #tpu.memory_space<vmem>>, vector<8x128xbf16>
    tpu.vector_store %arg7[%c0_12, %c0_13], %14 {strides = array<i32>} : memref<8x128xbf16, #tpu.memory_space<vmem>>, vector<8x128xbf16>,
    return
  }
  func.func @transform_0(%arg0: i32) -> (i32, i32) {
    %c0_i32 = arith.constant 0 : i32
    %c0_i32_0 = arith.constant 0 : i32
    return %arg0, %c0_i32 : i32, i32
  }
  func.func @transform_1(%arg0: i32) -> (i32, i32) {
    %c0_i32 = arith.constant 0 : i32
    %c0_i32_0 = arith.constant 0 : i32
    %c0_i32_1 = arith.constant 0 : i32
    return %c0_i32, %c0_i32_0 : i32, i32
  }
  func.func @transform_2(%arg0: i32) -> (i32, i32) {
    %c0_i32 = arith.constant 0 : i32
    %c0_i32_0 = arith.constant 0 : i32
    %c0_i32_1 = arith.constant 0 : i32
    return %c0_i32, %c0_i32_0 : i32, i32
  }
  func.func @transform_3(%arg0: i32) -> (i32, i32) {
    %c0_i32 = arith.constant 0 : i32
    %c0_i32_0 = arith.constant 0 : i32
    %c0_i32_1 = arith.constant 0 : i32
    return %c0_i32, %c0_i32_0 : i32, i32
  }
  func.func @transform_4(%arg0: i32) -> (i32, i32) {
    %c0_i32 = arith.constant 0 : i32
    %c0_i32_0 = arith.constant 0 : i32
    %c0_i32_1 = arith.constant 0 : i32
    return %c0_i32, %c0_i32_0 : i32, i32
  }
  func.func @transform_5(%arg0: i32) -> (i32, i32) {
    %c0_i32 = arith.constant 0 : i32
    %c0_i32_0 = arith.constant 0 : i32
    return %arg0, %c0_i32 : i32, i32
  }
  func.func @transform_6(%arg0: i32) -> (i32, i32) {
    %c0_i32 = arith.constant 0 : i32
    %c0_i32_0 = arith.constant 0 : i32
    return %arg0, %c0_i32 : i32, i32
  }
}

</mosaic_0001>

<bundles_post_ra>
// kernel: tpu_custom_call.1
= control target key start
LH: loop header
LB: loop body
LE: loop exit
PB: predicated region body
PF: predicated region fallthrough
CT: control target
= control target key end

     0   :  { %12 = vsyncpa [#allocation3], 0  ;;  %s527_s0 = inlined_call_operand.hbm [shape: f32[8,32], index: 0, kind: input, shape index: {}]   ;;  %s528_s1 = inlined_call_operand.hbm [shape: bf16[32,256], index: 1, kind: input, shape index: {}]   ;;  %s529_s2 = inlined_call_operand.vmem [shape: f32[1,256], index: 2, kind: input, shape index: {}]   ;;  %s530_s3 = inlined_call_operand.hbm [shape: bf16[32,128], index: 3, kind: input, shape index: {}]   ;;  %s531_s4 = inlined_call_operand.vmem [shape: f32[1,128], index: 4, kind: input, shape index: {}]   ;;  %s532_s5 = inlined_call_operand.hbm [shape: bf16[8,256], index: 5, kind: output, shape index: {0}]   ;;  %s533_s6 = inlined_call_operand.hbm [shape: bf16[8,128], index: 6, kind: output, shape index: {1}]  }
   0x1   :  { %13 = vsyncpa [#allocation6], 0 }
   0x2   :  { %14 = vsyncpa [#allocation4], 0 }
   0x3   :  { %15 = vsyncpa [#allocation10], 0  ;;  %s414_s21 = smov [#allocation5]   ;;  %s296_s25 = scalar_lea.hbm %s528_s1, 512 }
   0x4   :  { %s31_s22 = sshll.u32 %s414_s21, 4  ;;  %p297_p0 = scmp.ne.s32.totalorder %s528_s1, %s296_s25  ;;  %s32_s22 = int_to_ptr.vmem [resolvable:$true] %s31_s22 }
   0x5   :  { %p300_p1 = scmp.lt.u32.totalorder %s296_s25, %s528_s1 }
   0x7   :  { %p302_p2 = pnand %p300_p1, %p297_p0 }
   0x9   :  { %305 = shalt.err (!%p302_p2)
}
   0xa   :  { %s306_s30 = scalar_lea.vmem %s32_s22, 512  ;;  %p311_p4 = scmp.lt.s32.totalorder %s32_s22, %s32_s22 }
   0xb   :  { %p307_p3 = scmp.ne.s32.totalorder %s32_s22, %s306_s30  ;;  %p312_p5 = scmp.lt.s32.totalorder %s306_s30, %s306_s30 }
   0xd   :  { %p313_p6 = por %p312_p5, %p311_p4 }
   0xf   :  { %p314_p7 = pnand %p313_p6, %p307_p3 }
  0x11   :  { %317 = shalt.err (!%p314_p7)
}
  0x12   :  { %s415_s7 = smov 128   ;;  %s416_s8 = smov 8  }
  0x13   :  { %37 = dma.hbm_to_vmem [thread:$0]  %s528_s1, 512, %s32_s22, [#allocation6], %s415_s7, %s415_s7, %s416_s8  }
  0x14   :  { %s417_s11 = smov [#allocation2]   ;;  %s418_s13 = smov [#allocation7]  }
  0x15   :  { %s22_s12 = sshll.u32 %s417_s11, 4  ;;  %s45_s14 = sshll.u32 %s418_s13, 4  ;;  %s23_s12 = int_to_ptr.vmem [resolvable:$true] %s22_s12  ;;  %s46_s14 = int_to_ptr.vmem [resolvable:$true] %s45_s14 }
  0x16   :  { %s318_s17 = scalar_lea.hbm %s527_s0, 128 }
  0x17   :  { %p319_p8 = scmp.ne.s32.totalorder %s527_s0, %s318_s17  ;;  %p322_p9 = scmp.lt.u32.totalorder %s318_s17, %s527_s0 }
  0x19   :  { %p324_p10 = pnand %p322_p9, %p319_p8 }
  0x1b   :  { %327 = shalt.err (!%p324_p10)
}
  0x1c   :  { %s328_s1 = scalar_lea.vmem %s23_s12, 128  ;;  %p333_p12 = scmp.lt.s32.totalorder %s23_s12, %s23_s12 }
  0x1d   :  { %p329_p11 = scmp.ne.s32.totalorder %s23_s12, %s328_s1  ;;  %p334_p13 = scmp.lt.s32.totalorder %s328_s1, %s328_s1 }
  0x1f   :  { %p335_p0 = por %p334_p13, %p333_p12 }
  0x21   :  { %p336_p1 = pnand %p335_p0, %p329_p11 }
  0x23   :  { %339 = shalt.err (!%p336_p1)
}
  0x24   :  { %25 = dma.hbm_to_vmem [thread:$0]  %s527_s0, 128, %s23_s12, [#allocation3]  }
  0x25   :  { %s340_s26 = scalar_lea.hbm %s530_s3, 256 }
  0x26   :  { %p341_p2 = scmp.ne.s32.totalorder %s530_s3, %s340_s26  ;;  %p344_p3 = scmp.lt.u32.totalorder %s340_s26, %s530_s3 }
  0x28   :  { %p346_p4 = pnand %p344_p3, %p341_p2 }
  0x2a   :  { %349 = shalt.err (!%p346_p4)
}
  0x2b   :  { %s350_s7 = scalar_lea.vmem %s46_s14, 256  ;;  %p355_p6 = scmp.lt.s32.totalorder %s46_s14, %s46_s14 }
  0x2c   :  { %p351_p5 = scmp.ne.s32.totalorder %s46_s14, %s350_s7  ;;  %p356_p7 = scmp.lt.s32.totalorder %s350_s7, %s350_s7 }
  0x2e   :  { %p357_p8 = por %p356_p7, %p355_p6 }
  0x30   :  { %p358_p9 = pnand %p357_p8, %p351_p5 }
  0x32   :  { %361 = shalt.err (!%p358_p9)
}
  0x33   :  { %s419_s0 = smov 64   ;;  %s420_s8 = smov 4  }
  0x34   :  { %51 = dma.hbm_to_vmem [thread:$0]  %s530_s3, 256, %s46_s14, [#allocation6], %s419_s0, %s419_s0, %s420_s8  }
  0x35   :  { %406 = dma.done.wait [#allocation3], 128  }
  0x36   :  { %407 = vsyncadd [#allocation3], 4294967168 }
  0x37   :  { %408 = dma.done.wait [#allocation6], 768  }
  0x38   :  { %409 = vsyncadd [#allocation6], 4294966528  ;;  %v421_v0 = vmov 0.0   ;;  %vm422_vm0 = vmmov 0   ;;  %v423_v1 = vmov 0   ;;  %v290_v3 = vld [vmem:[#allocation7] sm:$0xff]   ;;  %v137_v10 = vlaneseq }
  0x39   :  { %268 = vmatprep.subr.bf16.mxu1 %v421_v0  ;;  %272 = vmatprep.mubr.msk.bf16.mxu1 %vm422_vm0, %v421_v0  ;;  %v288_v2 = vld [vmem:[#allocation5 + $0x4] ss:$8 sps:$4 sm:$0xff]   ;;  %v291_v4 = vld [vmem:[#allocation5] ss:$8 sps:$4 sm:$0xff]   ;;  %v292_v5 = vld [vmem:[#allocation5 + $0x14] ss:$8 sps:$4 sm:$0xff]  }
  0x3a   :  { %126 = vmatprep.mubr.bf16.mxu0 %v423_v1  ;;  %94 = vmatprep.subr.bf16.mxu0 %v288_v2  ;;  %v294_v6 = vld [vmem:[#allocation7 + $0x8] sm:$0xff]   ;;  %v295_v7 = vld [vmem:[#allocation5 + $0x10] ss:$8 sps:$4 sm:$0xff]   ;;  %vm90_vm1 = vcmask 261120   ;;  %v138_v11 = vshrl.u32 %v137_v10, 7  ;;  %s424_s14 = smov [#allocation9]  }
  0x3b   :  { %269 = vmatpush3.bf16.msra.mxu1 %v290_v3  ;;  %95 = vmatpush1.bf16.msra.mxu0 %v291_v4  ;;  %v64_v8 = vld [vmem:[#allocation2] sm:$0xff]  ;;  %s240_s15 = sshll.u32 %s424_s14, 4  ;;  %s425_s16 = smov [#allocation8]   ;;  %s241_s15 = int_to_ptr.vmem [resolvable:$true] %s240_s15 }
  0x3c   :  { %270 = vmatprep.subr.bf16.mxu1 %v421_v0  ;;  %96 = vmatprep.subr.bf16.mxu0 %v292_v5  ;;  %v65_v9 = vpack.c.bf16 %v64_v8, %v64_v8  ;;  %v139_v12 = vsub.s32 0, %v138_v11  ;;  %v135_v13 = vld [vmem:[%s529_s2] sm:$0x3]  ;;  %v143_v14 = vsub.s32 1, %v138_v11  ;;  %s230_s17 = sshll.u32 %s425_s16, 4  ;;  %s362_s2 = scalar_lea.vmem %s241_s15, 64  ;;  %s231_s17 = int_to_ptr.vmem [resolvable:$true] %s230_s17 }
  0x3d   :  { %v263_v15 = vld [vmem:[%s531_s4] ss:$0 sm:$0xff]  ;;  %p363_p10 = scmp.ne.s32.totalorder %s241_s15, %s362_s2  ;;  %p367_p11 = scmp.lt.s32.totalorder %s241_s15, %s241_s15 }
  0x3e   :  { %v140_v16 = vrot.slane %v135_v13, %v139_v12  ;;  %v144_v17 = vrot.slane %v135_v13, %v143_v14  ;;  %p368_p12 = scmp.lt.s32.totalorder %s362_s2, %s362_s2 }
  0x3f   :  { %271 = vmatpush3.bf16.msra.mxu1 %v294_v6  ;;  %97 = vmatpush1.bf16.msra.mxu0 %v295_v7 }
  0x40   :  { %p369_p13 = por %p368_p12, %p367_p11 }
  0x42   :  { %273 = vmatmul.mubr.msk.bf16.vlgmr.msra.gmra.mrb[0].mxu1 %vm90_vm1, %v65_v9  ;;  %258 = vmatmul.mubr.msk.bf16.vlgmr.msra.gmra.mrb[0].mxu0 %vm90_vm1, %v65_v9  ;;  %p370_p0 = pnand %p369_p13, %p363_p10 }
 0x115   :  { %v208_v18 = vpop.f32.mrb[0].mxu1  ;;  %v128_v20 = vpop.f32.mrb[0].mxu0 }
 0x116   :  { %v221_v19 = vsub.f32 %v208_v18, %v263_v15  ;;  %v274_v21 = vpop.f32.mrb[1].mxu1  ;;  %v147_v22 = vsub.f32 %v128_v20, %v140_v16  ;;  %v130_v23 = vpop.f32.mrb[1].mxu0 }
 0x117   :  { %v211_v24 = vpop.f32.mrb[2].mxu1  ;;  %v148_v26 = vsub.f32 %v130_v23, %v144_v17  ;;  %v132_v27 = vpop.f32.mrb[2].mxu0 }
 0x118   :  { %v222_v25 = vpack.c.bf16 %v221_v19, %v221_v19  ;;  %v275_v28 = vpop.f32.mrb[3].mxu1  ;;  %v133_v29 = vpop.f32.mrb[3].mxu0 }
 0x119   :  { %v264_v30 = vpack.c.bf16 %v148_v26, %v147_v22 }
 0x11a   :  { %223 = vst [vmem:[#allocation9] sm:$0xf] %v222_v25 }
 0x11b   :  { %373 = shalt.err (!%p370_p0)
}
 0x11c   :  { %s374_s19 = scalar_lea.hbm %s533_s6, 64 }
 0x11d   :  { %p375_p1 = scmp.ne.s32.totalorder %s533_s6, %s374_s19  ;;  %p378_p2 = scmp.lt.u32.totalorder %s374_s19, %s533_s6 }
 0x11f   :  { %p380_p3 = pnand %p378_p2, %p375_p1 }
 0x121   :  { %383 = shalt.err (!%p380_p3)
}
 0x122   :  { %243 = dma.vmem_to_hbm [thread:$0]  %s241_s15, 64, %s533_s6, [#allocation10]   ;;  %157 = vst [vmem:[#allocation8] sm:$0xff] %v264_v30 }
 0x123   :  { %s384_s25 = scalar_lea.vmem %s231_s17, 128  ;;  %p389_p5 = scmp.lt.s32.totalorder %s231_s17, %s231_s17 }
 0x124   :  { %p385_p4 = scmp.ne.s32.totalorder %s231_s17, %s384_s25  ;;  %p390_p6 = scmp.lt.s32.totalorder %s384_s25, %s384_s25 }
 0x126   :  { %p391_p7 = por %p390_p6, %p389_p5 }
 0x128   :  { %p392_p8 = pnand %p391_p7, %p385_p4 }
 0x12a   :  { %395 = shalt.err (!%p392_p8)
}
 0x12b   :  { %s396_s28 = scalar_lea.hbm %s532_s5, 128 }
 0x12c   :  { %p397_p9 = scmp.ne.s32.totalorder %s532_s5, %s396_s28  ;;  %p400_p10 = scmp.lt.u32.totalorder %s396_s28, %s532_s5 }
 0x12e   :  { %p402_p11 = pnand %p400_p10, %p397_p9 }
 0x130   :  { %405 = shalt.err (!%p402_p11)
}
 0x131   :  { %233 = dma.vmem_to_hbm [thread:$0]  %s231_s17, 128, %s532_s5, [#allocation4]  }
 0x132   :  { %410 = dma.done.wait [#allocation4], 128  }
 0x133   :  { %411 = vsyncadd [#allocation4], 4294967168 }
 0x134   :  { %412 = dma.done.wait [#allocation10], 64  }
 0x135   :  { %413 = vsyncadd [#allocation10], 4294967232 }
 0x136   :  { %250 = vsyncpa [#allocation3], 1 }
 0x137   :  { %251 = vsyncpa [#allocation6], 1 }
 0x138   :  { %252 = vsyncpa [#allocation4], 1 }
 0x139   :  { %253 = vsyncpa [#allocation10], 1 }

</bundles_post_ra>
